<compile_context>
chip_gen: v5e
topology: v5e:2x2
jax: 0.10.0
libtpu: 0.0.40
codegen_flags: <defaults>
</compile_context>

<pallas_src>
import functools

import jax
import jax.numpy as jnp
from jax import lax
from jax.experimental import pallas as pl
from jax.experimental.pallas import tpu as pltpu


def _round_up(x, m):
    return ((x + m - 1) // m) * m


def _sdpa_kernel(*refs, scale, has_mask, mxu_dtype):
    if has_mask:
        q_ref, k_ref, v_ref, mask_ref, out_ref, attn_ref = refs
    else:
        q_ref, k_ref, v_ref, out_ref, attn_ref = refs
        mask_ref = None

    # Fold 1/sqrt(d_model) into q (TQ*D multiplies instead of TQ*Lk), then cast
    # both MXU operands to bf16 (accumulation stays f32 via preferred_element_type).
    q = (q_ref[0] * jnp.asarray(scale, q_ref.dtype)).astype(mxu_dtype)   # (TQ, D)
    k = k_ref[0].astype(mxu_dtype)                                       # (Lk, D)

    # attn = (q / temper) @ k^T: contract the LAST dims of both operands so no
    # explicit transpose / XLU relayout of k is materialized before the MXU.
    scores = lax.dot_general(
        q, k,
        dimension_numbers=(((1,), (1,)), ((), ())),
        preferred_element_type=jnp.float32)                              # (TQ, Lk) f32

    if has_mask:
        # masked_fill_(attn_mask, -inf): large finite negative so fully masked
        # rows give uniform weights instead of NaNs.
        scores = jnp.where(mask_ref[0] != 0, jnp.float32(-1e30), scores)

    # Softmax over the key axis (== BottleSoftmax(dim=1) on the (B*Lq, Lk) view).
    m = jnp.max(scores, axis=-1, keepdims=True)
    e = jnp.exp(scores - m)
    s = jnp.sum(e, axis=-1, keepdims=True)
    attn = e * pl.reciprocal(s, approx=True)          # EUP slot, VALU-free

    # Store attn before the PV matmul to cut the number of live (TQ, Lk)
    # f32 temporaries (less VMEM / spill pressure at long Lk).
    attn_ref[0] = attn.astype(attn_ref.dtype)

    # TODO(synk): nn.Dropout(0.1) is identity in eval mode; training-time
    # stochastic dropout (pltpu.prng_*) is omitted here.

    # output = attn @ v  (bf16 operands, f32 accumulation).
    v = v_ref[0].astype(mxu_dtype)
    out = jnp.dot(attn.astype(mxu_dtype), v, preferred_element_type=jnp.float32)
    out_ref[0] = out.astype(out_ref.dtype)


def scaled_dot_product_attention(q, k, v, attn_mask=None, *, d_model=None,
                                 tq=128, attn_dtype=None,
                                 mxu_dtype=jnp.bfloat16):
    """q: (B, Lq, D), k: (B, Lk, D), v: (B, Lk, Dv).
    attn_mask: optional (B, Lq, Lk) bool/int, True/1 means masked out.
    Returns (output, attn) exactly like the PyTorch module (eval mode)."""
    B, Lq, D = q.shape
    _, Lk, Dk = k.shape
    _, _, Dv = v.shape
    assert Dk == D and k.shape[0] == B and v.shape[0] == B and v.shape[1] == Lk

    if d_model is None:
        d_model = D
    scale = 1.0 / (float(d_model) ** 0.5)
    if attn_dtype is None:
        attn_dtype = q.dtype

    # Query-tile size: multiple of 8 sublanes. 128 keeps v5e's 4x128 MXU fully
    # fed, halves (TQ, Lk) intermediates vs 256, and gives both v7x TCs work
    # even at small B.
    TQ = min(_round_up(tq, 8), _round_up(Lq, 8))
    grid = (B, pl.cdiv(Lq, TQ))

    # Blocks: last two dims are multiples of 8 (TQ) or equal to the full array
    # dim (D, Dv, Lk), so NO wrapper-side padding is needed.
    in_specs = [
        pl.BlockSpec((1, TQ, D), lambda b, i: (b, i, 0)),
        # K / V blocks ignore the q-tile index -> resident per batch element,
        # no re-DMA across the inner grid axis.
        pl.BlockSpec((1, Lk, D), lambda b, i: (b, 0, 0)),
        pl.BlockSpec((1, Lk, Dv), lambda b, i: (b, 0, 0)),
    ]
    inputs = [q, k, v]

    has_mask = attn_mask is not None
    if has_mask:
        assert attn_mask.shape == (B, Lq, Lk), (
            f"Attention mask shape {attn_mask.shape} mismatch with "
            f"attention logit shape {(B, Lq, Lk)}")
        # int8 mask: 4x less HBM->VMEM traffic than int32.
        inputs.append(attn_mask.astype(jnp.int8))
        in_specs.append(pl.BlockSpec((1, TQ, Lk), lambda b, i: (b, i, 0)))

    out_specs = [
        pl.BlockSpec((1, TQ, Dv), lambda b, i: (b, i, 0)),
        pl.BlockSpec((1, TQ, Lk), lambda b, i: (b, i, 0)),
    ]
    out_shape = (
        jax.ShapeDtypeStruct((B, Lq, Dv), q.dtype),
        jax.ShapeDtypeStruct((B, Lq, Lk), attn_dtype),
    )

    # Explicit VMEM budget (default scoped limit is only 16/32 MiB on
    # v5e / v6e+v7x): double-buffered q/k/v/mask/out/attn tiles plus the live
    # (TQ, Lk) f32 softmax intermediates, with 1.5x headroom, capped at 96 MiB.
    isz = jnp.dtype(q.dtype).itemsize
    attn_isz = jnp.dtype(attn_dtype).itemsize
    est = (2 * TQ * D * isz                 # q
           + 2 * Lk * D * isz               # k (resident)
           + 2 * Lk * Dv * isz              # v (resident)
           + (2 * TQ * Lk if has_mask else 0)
           + 2 * TQ * Dv * isz              # out
           + 2 * TQ * Lk * attn_isz         # attn
           + 4 * TQ * Lk * 4                # live f32 scores/e/attn
           + 2 * (TQ + Lk) * max(D, Dv) * 2)  # bf16 operand temps
    vmem_limit = int(min(max(est * 3 // 2, 32 << 20), 96 << 20))

    kernel = functools.partial(_sdpa_kernel, scale=scale, has_mask=has_mask,
                               mxu_dtype=mxu_dtype)

    out, attn = pl.pallas_call(
        kernel,
        out_shape=out_shape,
        grid_spec=pltpu.PrefetchScalarGridSpec(
            num_scalar_prefetch=0,
            grid=grid,
            in_specs=in_specs,
            out_specs=out_specs,
        ),
        compiler_params=pltpu.CompilerParams(
            dimension_semantics=("parallel", "parallel"),
            vmem_limit_bytes=vmem_limit),
    )(*inputs)
    return out, attn


def _reference(q, k, v, attn_mask, d_model):
    temper = float(d_model) ** 0.5
    scores = jnp.einsum("bqd,bkd->bqk", q, k) / temper
    if attn_mask is not None:
        scores = jnp.where(attn_mask, -jnp.inf, scores)
    attn = jax.nn.softmax(scores, axis=-1)
    out = jnp.einsum("bqk,bkd->bqd", attn, v)
    return out, attn


if __name__ == "__main__":
    key = jax.random.PRNGKey(0)

    # --- small shapes consistent with the module, masked path ---
    B, Lq, Lk, D, Dv = 2, 8, 8, 32, 32
    kq, kk, kv, km = jax.random.split(key, 4)

    q = jax.random.normal(kq, (B, Lq, D), dtype=jnp.float32)
    k = jax.random.normal(kk, (B, Lk, D), dtype=jnp.float32)
    v = jax.random.normal(kv, (B, Lk, Dv), dtype=jnp.float32)
    # Partial mask (never masks a full row, so the reference has no NaN rows).
    mask = (jax.random.uniform(km, (B, Lq, Lk)) < 0.3)
    mask = mask.at[:, :, 0].set(False)

    out, attn = scaled_dot_product_attention(q, k, v, attn_mask=mask, d_model=D)
    jax.block_until_ready((out, attn))

    ref_out, ref_attn = _reference(q, k, v, mask, D)
    # bf16 MXU operands + approx EUP reciprocal -> ~1e-3 relative error budget.
    assert jnp.allclose(out, ref_out, atol=1e-2, rtol=1e-2)
    assert jnp.allclose(attn, ref_attn, atol=1e-2, rtol=1e-2)

    # --- aligned shapes exercising the multi-tile query grid, no mask ---
    B2, Lq2, Lk2, D2, Dv2 = 1, 256, 256, 128, 128
    kq2, kk2, kv2 = jax.random.split(jax.random.PRNGKey(1), 3)
    q2 = jax.random.normal(kq2, (B2, Lq2, D2), dtype=jnp.float32)
    k2 = jax.random.normal(kk2, (B2, Lk2, D2), dtype=jnp.float32)
    v2 = jax.random.normal(kv2, (B2, Lk2, Dv2), dtype=jnp.float32)

    out2, attn2 = scaled_dot_product_attention(q2, k2, v2, d_model=D2)
    jax.block_until_ready((out2, attn2))

    ref_out2, ref_attn2 = _reference(q2, k2, v2, None, D2)
    assert jnp.allclose(out2, ref_out2, atol=1e-2, rtol=1e-2)
    assert jnp.allclose(attn2, ref_attn2, atol=1e-2, rtol=1e-2)

    print("KERNEL_OK")
</pallas_src>

<mosaic_0001>
module attributes {stable_mosaic.version = 11 : i64} {
  func.func @_sdpa_kernel(%arg0: i32, %arg1: i32, %arg2: memref<1x8x32xf32, #tpu.memory_space<vmem>>, %arg3: memref<1x8x32xf32, #tpu.memory_space<vmem>>, %arg4: memref<1x8x32xf32, #tpu.memory_space<vmem>>, %arg5: memref<1x8x8xi8, #tpu.memory_space<vmem>>, %arg6: memref<1x8x32xf32, #tpu.memory_space<vmem>>, %arg7: memref<1x8x8xf32, #tpu.memory_space<vmem>>) attributes {dimension_semantics = [#tpu.dimension_semantics<parallel>, #tpu.dimension_semantics<parallel>], iteration_bounds = array<i64: 2, 1>, scalar_prefetch = 0 : i64, scratch_operands = 0 : i64, tpu.core_type = #tpu.core_type<tc>, window_params = [{transform_indices = @transform_0, window_bounds = array<i64: 1, 8, 32>}, {transform_indices = @transform_1, window_bounds = array<i64: 1, 8, 32>}, {transform_indices = @transform_2, window_bounds = array<i64: 1, 8, 32>}, {transform_indices = @transform_3, window_bounds = array<i64: 1, 8, 8>}, {transform_indices = @transform_4, window_bounds = array<i64: 1, 8, 32>}, {transform_indices = @transform_5, window_bounds = array<i64: 1, 8, 8>}]} {
    %c0 = arith.constant 0 : index
    %c0_0 = arith.constant 0 : index
    %c0_1 = arith.constant 0 : index
    %0 = vector.load %arg2[%c0, %c0_0, %c0_1] : memref<1x8x32xf32, #tpu.memory_space<vmem>>, vector<1x8x32xf32>
    %1 = vector.shape_cast %0 : vector<1x8x32xf32> to vector<8x32xf32>
    %cst = arith.constant 0.176776692 : f32
    %2 = vector.broadcast %cst : f32 to vector<8x32xf32>
    %3 = arith.mulf %1, %2 : vector<8x32xf32>
    %4 = arith.truncf %3 : vector<8x32xf32> to vector<8x32xbf16>
    %c0_2 = arith.constant 0 : index
    %c0_3 = arith.constant 0 : index
    %c0_4 = arith.constant 0 : index
    %5 = vector.load %arg3[%c0_2, %c0_3, %c0_4] : memref<1x8x32xf32, #tpu.memory_space<vmem>>, vector<1x8x32xf32>
    %6 = vector.shape_cast %5 : vector<1x8x32xf32> to vector<8x32xf32>
    %7 = arith.truncf %6 : vector<8x32xf32> to vector<8x32xbf16>
    %cst_5 = arith.constant dense<0.000000e+00> : vector<8x8xf32>
    %8 = tpu.matmul %4, %7, %cst_5 {dimension_numbers = #tpu.dot_dimension_numbers<[1], [1], [0], [0], [0, 0, 1, 0], [], []>} : vector<8x32xbf16>, vector<8x32xbf16>, vector<8x8xf32> -> vector<8x8xf32>
    %c0_6 = arith.constant 0 : index
    %c0_7 = arith.constant 0 : index
    %c0_8 = arith.constant 0 : index
    %9 = vector.load %arg5[%c0_6, %c0_7, %c0_8] : memref<1x8x8xi8, #tpu.memory_space<vmem>>, vector<1x8x8xi8>
    %10 = vector.shape_cast %9 : vector<1x8x8xi8> to vector<8x8xi8>
    %c0_i8 = arith.constant 0 : i8
    %11 = vector.broadcast %c0_i8 : i8 to vector<8x8xi8>
    %12 = arith.cmpi ne, %10, %11 : vector<8x8xi8>
    %cst_9 = arith.constant -1.000000e+30 : f32
    %13 = vector.broadcast %cst_9 : f32 to vector<8x8xf32>
    %14 = arith.select %12, %13, %8 : vector<8x8xi1>, vector<8x8xf32>
    %cst_10 = arith.constant dense<0xFF800000> : vector<8xf32>
    %15 = vector.multi_reduction <maximumf>, %14, %cst_10 [1] : vector<8x8xf32> to vector<8xf32>
    %16 = vector.shape_cast %15 : vector<8xf32> to vector<8x1xf32>
    %17 = vector.broadcast %16 : vector<8x1xf32> to vector<8x8xf32>
    %18 = arith.subf %14, %17 : vector<8x8xf32>
    %19 = math.exp %18 : vector<8x8xf32>
    %cst_11 = arith.constant dense<0.000000e+00> : vector<8xf32>
    %20 = vector.multi_reduction <add>, %19, %cst_11 [1] : vector<8x8xf32> to vector<8xf32>
    %21 = vector.shape_cast %20 : vector<8xf32> to vector<8x1xf32>
    %22 = tpu.reciprocal %21 {approx = true} : vector<8x1xf32> -> vector<8x1xf32>
    %23 = vector.broadcast %22 : vector<8x1xf32> to vector<8x8xf32>
    %24 = arith.mulf %19, %23 : vector<8x8xf32>
    %c0_12 = arith.constant 0 : index
    %c0_13 = arith.constant 0 : index
    %c0_14 = arith.constant 0 : index
    %25 = vector.load %arg7[%c0_12, %c0_13, %c0_14] : memref<1x8x8xf32, #tpu.memory_space<vmem>>, vector<1x8x8xf32>
    %26 = vector.shape_cast %25 : vector<1x8x8xf32> to vector<8x8xf32>
    %27 = vector.shape_cast %24 : vector<8x8xf32> to vector<1x8x8xf32>
    tpu.vector_store %arg7[%c0_12, %c0_13, %c0_14], %27 {strides = array<i32>} : memref<1x8x8xf32, #tpu.memory_space<vmem>>, vector<1x8x8xf32>,
    %c0_15 = arith.constant 0 : index
    %c0_16 = arith.constant 0 : index
    %c0_17 = arith.constant 0 : index
    %28 = vector.load %arg4[%c0_15, %c0_16, %c0_17] : memref<1x8x32xf32, #tpu.memory_space<vmem>>, vector<1x8x32xf32>
    %29 = vector.shape_cast %28 : vector<1x8x32xf32> to vector<8x32xf32>
    %30 = arith.truncf %29 : vector<8x32xf32> to vector<8x32xbf16>
    %31 = arith.truncf %24 : vector<8x8xf32> to vector<8x8xbf16>
    %cst_18 = arith.constant dense<0.000000e+00> : vector<8x32xf32>
    %32 = tpu.matmul %31, %30, %cst_18 {dimension_numbers = #tpu.dot_dimension_numbers<[1], [0], [0], [1], [0, 0, 1, 1], [], []>} : vector<8x8xbf16>, vector<8x32xbf16>, vector<8x32xf32> -> vector<8x32xf32>
    %c0_19 = arith.constant 0 : index
    %c0_20 = arith.constant 0 : index
    %c0_21 = arith.constant 0 : index
    %33 = vector.load %arg6[%c0_19, %c0_20, %c0_21] : memref<1x8x32xf32, #tpu.memory_space<vmem>>, vector<1x8x32xf32>
    %34 = vector.shape_cast %33 : vector<1x8x32xf32> to vector<8x32xf32>
    %35 = vector.shape_cast %32 : vector<8x32xf32> to vector<1x8x32xf32>
    tpu.vector_store %arg6[%c0_19, %c0_20, %c0_21], %35 {strides = array<i32>} : memref<1x8x32xf32, #tpu.memory_space<vmem>>, vector<1x8x32xf32>,
    return
  }
  func.func @transform_0(%arg0: i32, %arg1: i32) -> (i32, i32, i32) {
    %c0_i32 = arith.constant 0 : i32
    %c0_i32_0 = arith.constant 0 : i32
    return %arg0, %arg1, %c0_i32 : i32, i32, i32
  }
  func.func @transform_1(%arg0: i32, %arg1: i32) -> (i32, i32, i32) {
    %c0_i32 = arith.constant 0 : i32
    %c0_i32_0 = arith.constant 0 : i32
    %c0_i32_1 = arith.constant 0 : i32
    return %arg0, %c0_i32, %c0_i32_0 : i32, i32, i32
  }
  func.func @transform_2(%arg0: i32, %arg1: i32) -> (i32, i32, i32) {
    %c0_i32 = arith.constant 0 : i32
    %c0_i32_0 = arith.constant 0 : i32
    %c0_i32_1 = arith.constant 0 : i32
    return %arg0, %c0_i32, %c0_i32_0 : i32, i32, i32
  }
  func.func @transform_3(%arg0: i32, %arg1: i32) -> (i32, i32, i32) {
    %c0_i32 = arith.constant 0 : i32
    %c0_i32_0 = arith.constant 0 : i32
    return %arg0, %arg1, %c0_i32 : i32, i32, i32
  }
  func.func @transform_4(%arg0: i32, %arg1: i32) -> (i32, i32, i32) {
    %c0_i32 = arith.constant 0 : i32
    %c0_i32_0 = arith.constant 0 : i32
    return %arg0, %arg1, %c0_i32 : i32, i32, i32
  }
  func.func @transform_5(%arg0: i32, %arg1: i32) -> (i32, i32, i32) {
    %c0_i32 = arith.constant 0 : i32
    %c0_i32_0 = arith.constant 0 : i32
    return %arg0, %arg1, %c0_i32 : i32, i32, i32
  }
}

</mosaic_0001>

<bundles_post_ra>
// kernel: tpu_custom_call.1
= control target key start
LH: loop header
LB: loop body
LE: loop exit
PB: predicated region body
PF: predicated region fallthrough
CT: control target
= control target key end

     0   :  { %s1267_s0 = inlined_call_operand.hbm [shape: f32[2,8,32], index: 0, kind: input, shape index: {}]   ;;  %s1268_s1 = inlined_call_operand.hbm [shape: f32[2,8,32], index: 1, kind: input, shape index: {}]   ;;  %s1269_s2 = inlined_call_operand.hbm [shape: f32[2,8,32], index: 2, kind: input, shape index: {}]   ;;  %s1270_s3 = inlined_call_operand.hbm [shape: s8[2,8,8], index: 3, kind: input, shape index: {}]   ;;  %s1271_s4 = inlined_call_operand.hbm [shape: f32[2,8,32], index: 4, kind: output, shape index: {0}]   ;;  %s1272_s5 = inlined_call_operand.hbm [shape: f32[2,8,8], index: 5, kind: output, shape index: {1}]  }
   0x1   :  { %1278 = sst [smem:[#allocation23_spill]] %s1267_s0 }
   0x2   :  { %1279 = sst [smem:[#allocation24_spill]] %s1268_s1 }
   0x3   :  { %11 = vsyncpa [#allocation3], 0 }
   0x4   :  { %13 = vsyncpa [#allocation3 + $0x1], 0 }
   0x5   :  { %14 = vsyncpa [#allocation6], 0 }
   0x6   :  { %16 = vsyncpa [#allocation6 + $0x1], 0 }
   0x7   :  { %17 = vsyncpa [#allocation9], 0 }
   0x8   :  { %19 = vsyncpa [#allocation9 + $0x1], 0 }
   0x9   :  { %20 = vsyncpa [#allocation4], 0 }
   0xa   :  { %22 = vsyncpa [#allocation4 + $0x1], 0 }
   0xb   :  { %23 = vsyncpa [#allocation12], 0 }
   0xc   :  { %25 = vsyncpa [#allocation12 + $0x1], 0  ;;  %s1067_s18 = smov 0   ;;  %s1069_s19 = smov 0  }
   0xd   :  { %s1071_s20 = smov 0   ;;  %s1073_s21 = smov 0  }
   0xe   :  { %s1075_s22 = smov 0   ;;  %s1077_s23 = smov 0  }
   0xf LB: > { %1280 = sst [smem:[#allocation18_spill]] %s1022_s20  ;;  %s1098_s24 = sadd.s32 4294967295, %s1034_s23   ;;  %s1034_s23 = sphi %s1077_s23, %s31_s23   ;;  %s1030_s22 = sphi %s1075_s22, %s1301_s22   ;;  %s1026_s21 = sphi %s1073_s21, %s1300_s21   ;;  %s1022_s20 = sphi %s1071_s20, %s1296_s20   ;;  %s1018_s19 = sphi %s1069_s19, %s1299_s19   ;;  %s1014_s18 = sphi %s1067_s18, %s1298_s18  }
  0x10   : > { %1281 = sst [smem:[#allocation19_spill]] %s1034_s23  ;;  %s679_s25 = sadd.s32 4294967294, %s1034_s23  }
  0x11   : > { %s43_s26 = sadd.s32 1, %s1030_s22  ;;  %s52_s27 = sadd.s32 1, %s1022_s20 }
  0x12   : > { %p45_p0 = scmp.ge.s32.totalorder %s43_s26, 2  ;;  %p59_p1 = scmp.ne.s32.totalorder %s1022_s20, %s1018_s19 }
  0x13   : > { %p60_p2 = scmp.eq.s32.totalorder %s1034_s23, 0  ;;  %p65_p3 = scmp.ne.s32.totalorder %s1018_s19, %s1014_s18 }
  0x14   : > { %s1303_s26 = smov (%p45_p0, %s43_s26), 0  ;;  %p66_p5 = scmp.eq.s32.totalorder %s1098_s24, 0 }
  0x15   : > { %1282 = sst [smem:[#allocation20_spill]] %s1303_s26  ;;  %p1110_p4 = por %p60_p2, %p59_p1 }
  0x16   : > { %s47_s29 = ssub.s32 %s1030_s22, %s1303_s26  ;;  %p171_p6 = scmp.eq.s32.totalorder %s1098_s24, 1 }
  0x17   : > { %p50_p7 = scmp.eq.s32.totalorder %s47_s29, 0  ;;  %p1118_p8 = por %p66_p5, %p65_p3 }
  0x18   : > { %p1122_p9 = por %p171_p6, %p59_p1  ;;  %p177_p10 = scmp.eq.s32.totalorder %s679_s25, 1 }
  0x19   : > { %s1127_s7 = scalar_select %p50_p7, %s1022_s20, %s52_s27  }
  0x1a   : > { %p1129_p11 = por %p177_p10, %p65_p3  ;;  %p681_p12 = scmp.ge.s32.totalorder %s1034_s23, 2 }
  0x1b   : > { %1286 = sst [smem:[#allocation21_spill]] %s1127_s7  ;;  %p737_p13 = scmp.lt.s32.totalorder %s1034_s23, 2 }
  0x1c   : > { %s1287_s8 = scalar_select %p1129_p11, 1, 0 }
  0x1d   : > { %s1136_s9 = sand.u32 1, %s1022_s20   ;;  %s683_s11 = sshll.u32 %s1030_s22, 3 }
  0x1e   : > { %1288 = sst [smem:[#allocation22_spill]] %s1287_s8  ;;  %s682_s10 = sshll.u32 %s1136_s9, 3 }
  0x1f   : > { %p1142_p0 = pnand %p737_p13, %p1110_p4  ;;  %s245_s13 = sand.u32 1, %s1034_s23  }
  0x20   : > { %s1290_s1 = sld [smem:[#allocation24_spill]]  ;;  %s249_s25 = scalar_lea.vmem [#allocation5], %s682_s10 }
  0x21   : > { %s257_s27 = sshll.u32 %s249_s25, 4  ;;  %s246_s29 = scalar_lea.sflag [#allocation6], %s245_s13  ;;  %s258_s27 = int_to_ptr.vmem [resolvable:$true] %s257_s27 }
  0x22   : > { %p690_p1 = scmp.ge.s32.totalorder %s1034_s23, 1  ;;  %p301_p2 = scmp.lt.s32.totalorder %s1034_s23, 3 }
  0x23   : > { %s1292_s0 = sld [smem:[#allocation23_spill]]  ;;  %s229_s25 = scalar_lea.vmem [#allocation2], %s682_s10 }
  0x24   : > { %p1154_p3 = pnand %p690_p1, %p301_p2  ;;  %s226_s13 = scalar_lea.sflag [#allocation3], %s1136_s9 }
  0x25   : > { %s272_s7 = scalar_lea.hbm %s1269_s2, %s683_s11  ;;  %s268_s23 = scalar_lea.vmem [#allocation7], %s682_s10 }
  0x26   : > { %s253_s16 = scalar_lea.hbm %s1290_s1, %s683_s11  ;;  %s238_s1 = sshll.u32 %s229_s25, 4  ;;  %s239_s1 = int_to_ptr.vmem [resolvable:$true] %s238_s1 }
  0x27   : > { %s255_s17 = sshll.u32 %s253_s16, 4  ;;  %s274_s20 = sshll.u32 %s272_s7, 4  ;;  %s256_s17 = int_to_ptr.hbm [resolvable:$true] %s255_s17  ;;  %s275_s20 = int_to_ptr.hbm [resolvable:$true] %s274_s20 }
  0x28   : > { %723 = dma.hbm_to_vmem [thread:$0]  (!%p1142_p0), %s256_s17, 128, %s258_s27, %s246_s29  }
  0x29   : > { %s234_s15 = scalar_lea.hbm %s1292_s0, %s683_s11  ;;  %s276_s26 = sshll.u32 %s268_s23, 4  ;;  %s277_s26 = int_to_ptr.vmem [resolvable:$true] %s276_s26 }
  0x2a   : > { %s236_s16 = sshll.u32 %s234_s15, 4  ;;  %s688_s14 = sshll.u32 %s1136_s9, 1  ;;  %s237_s16 = int_to_ptr.hbm [resolvable:$true] %s236_s16 }
  0x2b   : > { %720 = dma.hbm_to_vmem [thread:$0]  (!%p1142_p0), %s237_s16, 128, %s239_s1, %s226_s13  }
  0x2c   : > { %726 = dma.hbm_to_vmem [thread:$0]  (!%p1142_p0), %s275_s20, 128, %s277_s26, %s246_s29  }
  0x2d   : > { %s689_s15 = sshll.u32 %s1030_s22, 1  ;;  %s287_s1 = scalar_lea.vmem [#allocation8], %s688_s14 }
  0x2e   : > { %s292_s8 = scalar_lea.hbm %s1270_s3, %s689_s15  ;;  %s296_s16 = sshll.u32 %s287_s1, 4  ;;  %s297_s16 = int_to_ptr.vmem [resolvable:$true] %s296_s16 }
  0x2f   : > { %s294_s13 = sshll.u32 %s292_s8, 4  ;;  %s284_s11 = scalar_lea.sflag [#allocation9], %s1136_s9  ;;  %s295_s13 = int_to_ptr.hbm [resolvable:$true] %s294_s13 }
  0x30   : > { %729 = dma.hbm_to_vmem [thread:$0]  (!%p1142_p0), %s295_s13, 32, %s297_s16, %s284_s11  }
  0x31   : > { %305 = sbr.rel (%p1154_p3) target bundleno = 589 (0x24d), region = 36  ;;  %s1180_s20 = sand.u32 (!%p1154_p3), 1, %s1018_s19  }
  0x32   : > { %s1183_s23 = sshll.u32 (!%p1154_p3), %s1180_s20, 3  ;;  %s308_s0 = scalar_lea.sflag (!%p1154_p3), [#allocation3], %s1180_s20 }
  0x33   : > { %s311_s7 = scalar_lea.vmem (!%p1154_p3), [#allocation2], %s1183_s23 }
  0x36   : > { %993 = dma.done.wait (%p1118_p8), %s308_s0, 128  }
  0x37   : > { %995 = vsyncadd (%p1118_p8), %s308_s0, 4294967168  ;;  %s317_s8 = sand.u32 1, %s1098_s24   ;;  %s321_s10 = scalar_lea.vmem [#allocation5], %s1183_s23 }
  0x38   : > { %s318_s9 = scalar_lea.sflag [#allocation6], %s317_s8 }
  0x39   : > { %997 = dma.done.wait (%p1118_p8), %s318_s9, 256  }
  0x3a   : > { %999 = vsyncadd (%p1118_p8), %s318_s9, 4294967040  ;;  %s694_s12 = sshll.u32 %s1180_s20, 1  ;;  %s331_s29 = scalar_lea.vmem [#allocation7], %s1183_s23 }
  0x3b   : > { %s338_s28 = scalar_lea.sflag [#allocation9], %s1180_s20  ;;  %s341_s17 = scalar_lea.vmem [#allocation8], %s694_s12 }
  0x3c   : > { %1001 = dma.done.wait (%p1118_p8), %s338_s28, 32  }
  0x3d   : > { %1003 = vsyncadd (%p1118_p8), %s338_s28, 4294967264  ;;  %v395_v0 = vld [vmem:[%s321_s10] sm:$0xff]  ;;  %vm397_vm0 = vcmask 261120   ;;  %v392_v1 = vld [vmem:[%s311_s7] sm:$0xff]  ;;  %v1036_v7 = vmov 0   ;;  %vm423_vm3 = vcmask 64512  }
  0x3e   : > { %v396_v2 = vpack.c.bf16 %v395_v0, %v395_v0  ;;  %v393_v4 = vmul.f32 0.17677669, %v392_v1  ;;  %v417_v6 = vld [vmem:[%s341_s17] sm:$0x3]  ;;  %v436_v19 = vld [vmem:[%s331_s29] sm:$0xff]  ;;  %vm442_vm4 = vcmask 1043456  }
  0x3f   : > { %vm418_vm1 = vnez %v417_v6  ;;  %v437_v20 = vpack.c.bf16 %v436_v19, %v436_v19  ;;  %s388_s24 = scalar_lea.vmem [#allocation11], %s1183_s23  ;;  %s701_s30 = sshll.u32 %s1026_s21, 3 }
  0x40   : > { %v402_v3 = vsel %vm397_vm0, %v396_v2, 0  ;;  %v394_v5 = vpack.c.bf16 %v393_v4, %v393_v4  ;;  %v419_v8 = vsel %vm418_vm1, 16843009, %v1036_v7  ;;  %s492_s14 = scalar_lea.hbm %s1272_s5, %s701_s30  ;;  %s494_s15 = sshll.u32 %s388_s24, 4  ;;  %s495_s15 = int_to_ptr.vmem [resolvable:$true] %s494_s15 }
  0x41   : > { %411 = vmatpush.bf16.xpose.msra.mxu0 %v402_v3  ;;  %v420_v9 = vunpack.c.0.s8 %v419_v8  ;;  %v444_v21 = vsel %vm442_vm4, %v437_v20, 0  ;;  %s496_s25 = sshll.u32 %s492_s14, 4  ;;  %s466_s1 = scalar_lea.sflag [#allocation12], %s1180_s20  ;;  %s497_s25 = int_to_ptr.hbm [resolvable:$true] %s496_s25 }
  0x42   : > { %453 = vmatpush.bf16.msra.mxu1 %v444_v21  ;;  %s926_s16 = sshra.s32 %s497_s25, 4  ;;  %s932_s21 = scalar_lea.hbm %s1272_s5, 16  ;;  %s927_s16 = int_to_ptr.hbm [resolvable:$true] %s926_s16 }
  0x43   : > { %vm421_vm2 = vcmp.ne.s32.totalorder %v420_v9, 0  ;;  %s928_s13 = scalar_lea.hbm %s927_s16, 8  ;;  %p933_p7 = scmp.lt.s32.totalorder %s927_s16, %s1272_s5 }
  0x44   : > { %p929_p4 = scmp.ne.s32.totalorder %s927_s16, %s928_s13  ;;  %p934_p8 = scmp.lt.s32.totalorder %s932_s21, %s928_s13 }
  0x46   : > { %p930_p5 = pnand %p929_p4, %p1122_p9  ;;  %p935_p10 = por %p934_p8, %p933_p7 }
  0x48   : > { %697 = vmatmul.msk.bf16.vlgmr.msra.gmra.mxu0 %vm397_vm0, %v394_v5  ;;  %p931_p6 = pneg %p930_p5 }
  0x4a   : > { %p936_p13 = pnand %p935_p10, %p931_p6 }
  0xc5   : > { %v413_v10 = vpop.f32.mrf.mxu0 }
  0xc6   : > { %v422_v11 = vsel %vm421_vm2, -1e+30, %v413_v10 }
  0xc7   : > { %v424_v12 = vsel %vm423_vm3, %v422_v11, -inf }
  0xc8   : > { %425 = vmax.xlane.f32.xlu0 %v424_v12 }
  0xcd   : > { %v415_v13 = vpop.f32.mrf.mxu0 }
 0x13b   : > { %v426_v14 = vpop.xlane.xlu0 %425 }
 0x13c   : > { %v427_v15 = vsub.f32 %v422_v11, %v426_v14 }
 0x13e   : > { %v428_v16 = vmul.f32 1.442695, %v427_v15 }
 0x140   : > { %788 = vpow2.f32 %v428_v16 }
 0x146   : > { %v789_v17 = vpop.eup %788 }
 0x147   : > { %v430_v18 = vsel %vm423_vm3, %v789_v17, 0.0 }
 0x148   : > { %431 = vadd.xlane.f32.xlu0 %v430_v18 }
 0x1bb   : > { %v432_v22 = vpop.xlane.xlu0 %431 }
 0x1bc   : > { %790 = vrcp.f32 %v432_v22 }
 0x1c2   : > { %v791_v23 = vpop.eup %790 }
 0x1c3   : > { %v434_v24 = vmul.f32 %v791_v23, %v789_v17 }
 0x1c5   : > { %v438_v25 = vpack.c.bf16 %v434_v24, %v434_v24  ;;  %435 = vst.msk [vmem:[%s388_s24] sm:$0xff] %vm423_vm3, %v434_v24 }
 0x1c7   : > { %698 = vmatmul.msk.bf16.vlgmr.msra.gmra.mxu1 %vm423_vm3, %v438_v25 }
 0x1c8   : > { %939 = shalt.err (!%p936_p13)
}
 0x1c9   : > { %714 = dma.vmem_to_hbm [thread:$0]  (%p1122_p9), %s495_s15, 128, %s497_s25, %s466_s1  }
 0x1ca   : > { %s477_s12 = scalar_lea.hbm %s1271_s4, %s701_s30  ;;  %s381_s29 = scalar_lea.vmem [#allocation10], %s1183_s23 }
 0x1cb   : > { %s479_s28 = sshll.u32 %s381_s29, 4  ;;  %s481_s17 = sshll.u32 %s477_s12, 4  ;;  %s480_s28 = int_to_ptr.vmem [resolvable:$true] %s479_s28  ;;  %s482_s17 = int_to_ptr.hbm [resolvable:$true] %s481_s17 }
 0x1cc   : > { %s461_s24 = scalar_lea.sflag [#allocation4], %s1180_s20  ;;  %s954_s27 = sshra.s32 %s482_s17, 4  ;;  %s955_s27 = int_to_ptr.hbm [resolvable:$true] %s954_s27 }
 0x1cd   : > { %s956_s26 = scalar_lea.hbm %s955_s27, 8  ;;  %s960_s30 = scalar_lea.hbm %s1271_s4, 16 }
 0x1ce   : > { %p957_p0 = scmp.ne.s32.totalorder %s955_s27, %s956_s26  ;;  %p961_p3 = scmp.lt.s32.totalorder %s955_s27, %s1271_s4 }
 0x1cf   : > { %p962_p4 = scmp.lt.s32.totalorder %s960_s30, %s956_s26 }
 0x1d0   : > { %p958_p1 = pnand %p957_p0, %p1122_p9 }
 0x1d1   : > { %p963_p5 = por %p962_p4, %p961_p3 }
 0x1d2   : > { %p959_p2 = pneg %p958_p1 }
 0x1d4   : > { %p964_p6 = pnand %p963_p5, %p959_p2 }
 0x244   : > { %v455_v26 = vpop.f32.mrf.mxu1 }
 0x245   : > { %459 = vst.msk [vmem:[%s381_s29] sm:$0xff] %vm397_vm0, %v455_v26 }
 0x246   : > { %967 = shalt.err (!%p964_p6)
}
 0x247   : > { %713 = dma.vmem_to_hbm [thread:$0]  (%p1122_p9), %s480_s28, 128, %s482_s17, %s461_s24  }
 0x24c   : > { %v457_v27 = vpop.f32.mrf.mxu1 }
 0x24d PF: > { %s1294_s1 = sld [smem:[#allocation19_spill]]  ;;  %s508_s16 = sand.u32 1, %s1014_s18  }
 0x24e   : > { %p731_p7 = pnand %p681_p12, %p1129_p11  ;;  %s509_s13 = scalar_lea.sflag [#allocation4], %s508_s16 }
 0x250   : > { %p732_p8 = pneg %p731_p7 }
 0x252   : > { %1005 = dma.done.wait (%p732_p8), %s509_s13, 128  }
 0x253   : > { %1007 = vsyncadd (%p732_p8), %s509_s13, 4294967168  ;;  %s519_s11 = scalar_lea.sflag [#allocation12], %s508_s16 }
 0x254   : > { %1009 = dma.done.wait (%p732_p8), %s519_s11, 128  }
 0x255   : > { %1011 = vsyncadd (%p732_p8), %s519_s11, 4294967168  ;;  %s31_s23 = sadd.s32 1, %s1294_s1   ;;  %s1295_s6 = sld [smem:[#allocation18_spill]] }
 0x256   : > { %p28_p10 = scmp.ge.s32.totalorder %s31_s23, 4   ;;  %s1296_s20 = sld [smem:[#allocation21_spill]] }
 0x257   : > { %s1297_s0 = sld [smem:[#allocation20_spill]]  ;;  %s1298_s18 = smov %s1018_s19 }
 0x258   : > { %s1300_s21 = smov %s1030_s22 }
 0x259   :  { %30 = sbr.rel (!%p28_p10) target bundleno = 15 (0xf), region = 135 }
 0x25b   : > { %s1299_s19 = smov %s1295_s6 }
 0x25d   : > { %s1301_s22 = smov %s1297_s0 }
 0x25e   :  { %525 = vsyncpa [#allocation3], 1 }
 0x25f   :  { %527 = vsyncpa [#allocation3 + $0x1], 1 }
 0x260   :  { %528 = vsyncpa [#allocation6], 1 }
 0x261   :  { %530 = vsyncpa [#allocation6 + $0x1], 1 }
 0x262   :  { %531 = vsyncpa [#allocation9], 1 }
 0x263   :  { %533 = vsyncpa [#allocation9 + $0x1], 1 }
 0x264   :  { %534 = vsyncpa [#allocation4], 1 }
 0x265   :  { %536 = vsyncpa [#allocation4 + $0x1], 1 }
 0x266   :  { %537 = vsyncpa [#allocation12], 1 }
 0x267   :  { %539 = vsyncpa [#allocation12 + $0x1], 1 }

</bundles_post_ra>
